<compile_context>
chip_gen: v5e
topology: v5e:2x2
jax: 0.10.0
libtpu: 0.0.40
codegen_flags: <defaults>
</compile_context>

<pallas_src>
import functools
import math

import jax
import jax.numpy as jnp
import numpy as np
from jax.experimental import pallas as pl
from jax.experimental.pallas import tpu as pltpu


def _ghost_kernel(x_ref, w1_ref, b1_ref, wdw_ref, bdw_ref, mask_ref, out_ref,
                  *, W, TN):
    # x_ref    : (TN, Cin, HWp)  channel-major, flattened spatial on lanes
    # w1_ref   : (Cinit, Cin)    1x1 conv weight
    # b1_ref   : (Cinit, 1)      1x1 conv bias
    # wdw_ref  : (Cinit, 9)      3x3 depthwise taps, column t = ky*3 + kx
    # bdw_ref  : (Cinit, 1)      depthwise bias
    # mask_ref : (9, HWp)        precomputed zero-pad boundary mask per tap
    # out_ref  : (TN, Cout, HWp)
    Cin = x_ref.shape[1]
    Cinit = w1_ref.shape[0]
    Cout = out_ref.shape[1]
    HWp = x_ref.shape[2]

    w1 = w1_ref[...]
    b1 = b1_ref[...]
    wdw = wdw_ref[...]
    bdw = bdw_ref[...]
    masks = mask_ref[...]

    for n in range(TN):                       # static unroll, TN is small
        x = x_ref[n]                          # (Cin, HWp)

        # ---- primary conv: 1x1 conv + bias + ReLU -----------------------
        if Cin <= 8:
            # tiny Cin: exact unrolled VPU FMAs (MXU would be <1% utilised)
            acc1 = jnp.broadcast_to(b1, (Cinit, HWp))
            for ci in range(Cin):
                acc1 = acc1 + w1[:, ci:ci + 1] * x[ci:ci + 1, :]
        else:
            # MXU matmul on the otherwise-idle vector-extended slot; full-f32
            # passes keep exact torch semantics (swap to bf16 inputs in prod).
            acc1 = jnp.dot(w1, x, preferred_element_type=jnp.float32,
                           precision=jax.lax.Precision.HIGHEST) + b1
        x1 = jnp.maximum(acc1, 0.0)           # (Cinit, HWp)

        # ---- cheap op: 3x3 depthwise conv via lane rolls + masks --------
        acc2 = jnp.broadcast_to(bdw, (Cinit, HWp))
        for dy in (-1, 0, 1):
            for dx in (-1, 0, 1):
                s = dy * W + dx                       # flat spatial shift
                t = (dy + 1) * 3 + (dx + 1)           # torch tap index
                shifted = x1 if s == 0 else pltpu.roll(x1, (-s) % HWp, axis=1)
                if dy == 0 and dx == 0:
                    contrib = shifted                 # centre tap: no mask
                else:
                    contrib = shifted * masks[t:t + 1, :]
                acc2 = acc2 + wdw[:, t:t + 1] * contrib
        x2 = jnp.maximum(acc2, 0.0)                   # (Cinit, HWp)

        # ---- concat(channels)[:out_ch] in registers, one aligned store ---
        if Cout > Cinit:
            y = jnp.concatenate([x1, x2[:Cout - Cinit, :]], axis=0)
        else:
            y = x1[:Cout, :]
        out_ref[n] = y


def _build_tap_masks(H, W, HWp):
    """(9, HWp) f32 masks reproducing zero-padding of the 3x3 depthwise."""
    rows = np.arange(H)
    cols = np.arange(W)
    row_ok = {-1: rows >= 1, 0: np.ones(H, bool), 1: rows <= H - 2}
    col_ok = {-1: cols >= 1, 0: np.ones(W, bool), 1: cols <= W - 2}
    m = np.zeros((9, HWp), np.float32)
    for dy in (-1, 0, 1):
        for dx in (-1, 0, 1):
            t = (dy + 1) * 3 + (dx + 1)
            mm = (row_ok[dy][:, None] & col_ok[dx][None, :]).astype(np.float32)
            m[t, :H * W] = mm.reshape(H * W)
    return jnp.asarray(m)


def _pick_batch_tile(N, bytes_per_image, budget=2 << 20, max_tn=8):
    """Largest divisor of N (<= max_tn) whose input tile stays under budget."""
    tn = 1
    for cand in range(1, min(N, max_tn) + 1):
        if N % cand == 0 and cand * bytes_per_image <= budget:
            tn = cand
    return tn


def ghost_module_forward(x_nchw, w1, b1, wdw, bdw, out_ch):
    """GhostModule forward (default ratio=2 path).

    x_nchw : (N, Cin, H, W) f32
    w1     : (Cinit, Cin)   primary 1x1 conv weight (torch (Cinit,Cin,1,1) squeezed)
    b1     : (Cinit,)       primary conv bias
    wdw    : (Cinit, 3, 3)  depthwise conv weight (torch (new,1,3,3) squeezed)
    bdw    : (Cinit,)       depthwise conv bias
    returns (N, out_ch, H, W) f32
    """
    N, Cin, H, W = x_nchw.shape
    Cinit = w1.shape[0]
    assert out_ch <= 2 * Cinit, "GhostModule guarantees out_ch <= 2*init_channels"
    assert wdw.shape[0] == Cinit  # ratio=2 default. TODO(synk): other ratios.

    HW = H * W
    HWp = ((HW + 127) // 128) * 128           # lane-dense spatial dim

    x_flat = x_nchw.reshape(N, Cin, HW).astype(jnp.float32)
    if HWp != HW:
        x_flat = jnp.pad(x_flat, ((0, 0), (0, 0), (0, HWp - HW)))

    w1_k = w1.astype(jnp.float32)
    b1_k = b1.reshape(Cinit, 1).astype(jnp.float32)
    wdw_k = wdw.reshape(Cinit, 9).astype(jnp.float32)
    bdw_k = bdw.reshape(Cinit, 1).astype(jnp.float32)
    masks = _build_tap_masks(H, W, HWp)       # hoisted out of the grid loop

    TN = _pick_batch_tile(N, Cin * HWp * 4)
    grid = (N // TN,)

    kernel = functools.partial(_ghost_kernel, W=W, TN=TN)

    out_flat = pl.pallas_call(
        kernel,
        out_shape=jax.ShapeDtypeStruct((N, out_ch, HWp), jnp.float32),
        grid_spec=pltpu.PrefetchScalarGridSpec(
            num_scalar_prefetch=0,
            grid=grid,
            in_specs=[
                pl.BlockSpec((TN, Cin, HWp), lambda i: (i, 0, 0)),
                pl.BlockSpec((Cinit, Cin), lambda i: (0, 0)),
                pl.BlockSpec((Cinit, 1), lambda i: (0, 0)),
                pl.BlockSpec((Cinit, 9), lambda i: (0, 0)),
                pl.BlockSpec((Cinit, 1), lambda i: (0, 0)),
                pl.BlockSpec((9, HWp), lambda i: (0, 0)),
            ],
            out_specs=pl.BlockSpec((TN, out_ch, HWp), lambda i: (i, 0, 0)),
        ),
        compiler_params=pltpu.CompilerParams(
            dimension_semantics=("parallel",),    # megacore sharding on v7x
            vmem_limit_bytes=32 * 1024 * 1024,    # safe on v5e/v6e/v7x budgets
        ),
    )(x_flat, w1_k, b1_k, wdw_k, bdw_k, masks)

    return out_flat[:, :, :HW].reshape(N, out_ch, H, W)


def ghost_module_ref(x, w1, b1, wdw, bdw, out_ch):
    """Plain-JAX NCHW reference with exact f32 math (for verification)."""
    N, Cin, H, W = x.shape
    Cinit = w1.shape[0]
    acc = jnp.broadcast_to(b1[None, :, None, None], (N, Cinit, H, W))
    for ci in range(Cin):
        acc = acc + w1[None, :, ci, None, None] * x[:, ci:ci + 1, :, :]
    x1 = jnp.maximum(acc, 0.0)
    xp = jnp.pad(x1, ((0, 0), (0, 0), (1, 1), (1, 1)))
    acc2 = jnp.broadcast_to(bdw[None, :, None, None], x1.shape)
    for ky in range(3):
        for kx in range(3):
            acc2 = acc2 + xp[:, :, ky:ky + H, kx:kx + W] * \
                wdw[None, :, ky, kx, None, None]
    x2 = jnp.maximum(acc2, 0.0)
    return jnp.concatenate([x1, x2], axis=1)[:, :out_ch]


if __name__ == "__main__":
    def run_case(key, N, in_ch, out_ch, H, W):
        ratio = 2
        init_channels = math.ceil(out_ch / ratio)
        new_channels = init_channels * (ratio - 1)
        kx, kw1, kb1, kw2, kb2 = jax.random.split(key, 5)
        x = jax.random.normal(kx, (N, in_ch, H, W), dtype=jnp.float32)
        w1 = jax.random.normal(kw1, (init_channels, in_ch), jnp.float32) * 0.2
        b1 = jax.random.normal(kb1, (init_channels,), jnp.float32) * 0.1
        wdw = jax.random.normal(kw2, (new_channels, 3, 3), jnp.float32) * 0.2
        bdw = jax.random.normal(kb2, (new_channels,), jnp.float32) * 0.1

        out = ghost_module_forward(x, w1, b1, wdw, bdw, out_ch)
        out = jax.block_until_ready(out)
        ref = ghost_module_ref(x, w1, b1, wdw, bdw, out_ch)
        assert out.shape == (N, out_ch, H, W)
        err = float(jnp.max(jnp.abs(out - ref)))
        assert jnp.allclose(out, ref, atol=1e-4, rtol=1e-4), f"mismatch {err}"

    key = jax.random.PRNGKey(0)
    k1, k2 = jax.random.split(key)
    # Demo config (VPU 1x1 path, Cinit=4 handled by register-concat single store).
    run_case(k1, N=2, in_ch=4, out_ch=8, H=16, W=16)
    # GhostNet-ish stage (MXU 1x1 path, H*W = 196 padded to 256 lanes).
    run_case(k2, N=2, in_ch=16, out_ch=32, H=14, W=14)

    print("KERNEL_OK")
</pallas_src>

<mosaic_0001>
module attributes {stable_mosaic.version = 11 : i64} {
  func.func @_ghost_kernel(%arg0: i32, %arg1: memref<2x4x256xf32, #tpu.memory_space<vmem>>, %arg2: memref<4x4xf32, #tpu.memory_space<vmem>>, %arg3: memref<4x1xf32, #tpu.memory_space<vmem>>, %arg4: memref<4x9xf32, #tpu.memory_space<vmem>>, %arg5: memref<4x1xf32, #tpu.memory_space<vmem>>, %arg6: memref<9x256xf32, #tpu.memory_space<vmem>>, %arg7: memref<2x8x256xf32, #tpu.memory_space<vmem>>) attributes {dimension_semantics = [#tpu.dimension_semantics<parallel>], iteration_bounds = array<i64: 1>, scalar_prefetch = 0 : i64, scratch_operands = 0 : i64, tpu.core_type = #tpu.core_type<tc>, window_params = [{transform_indices = @transform_0, window_bounds = array<i64: 2, 4, 256>}, {pipeline_mode = #tpu.pipeline_mode<synchronous>, transform_indices = @transform_1, window_bounds = array<i64: 4, 4>}, {pipeline_mode = #tpu.pipeline_mode<synchronous>, transform_indices = @transform_2, window_bounds = array<i64: 4, 1>}, {pipeline_mode = #tpu.pipeline_mode<synchronous>, transform_indices = @transform_3, window_bounds = array<i64: 4, 9>}, {pipeline_mode = #tpu.pipeline_mode<synchronous>, transform_indices = @transform_4, window_bounds = array<i64: 4, 1>}, {pipeline_mode = #tpu.pipeline_mode<synchronous>, transform_indices = @transform_5, window_bounds = array<i64: 9, 256>}, {transform_indices = @transform_6, window_bounds = array<i64: 2, 8, 256>}]} {
    %c0 = arith.constant 0 : index
    %c0_0 = arith.constant 0 : index
    %0 = vector.load %arg2[%c0, %c0_0] : memref<4x4xf32, #tpu.memory_space<vmem>>, vector<4x4xf32>
    %c0_1 = arith.constant 0 : index
    %c0_2 = arith.constant 0 : index
    %1 = vector.load %arg3[%c0_1, %c0_2] : memref<4x1xf32, #tpu.memory_space<vmem>>, vector<4x1xf32>
    %c0_3 = arith.constant 0 : index
    %c0_4 = arith.constant 0 : index
    %2 = vector.load %arg4[%c0_3, %c0_4] : memref<4x9xf32, #tpu.memory_space<vmem>>, vector<4x9xf32>
    %c0_5 = arith.constant 0 : index
    %c0_6 = arith.constant 0 : index
    %3 = vector.load %arg5[%c0_5, %c0_6] : memref<4x1xf32, #tpu.memory_space<vmem>>, vector<4x1xf32>
    %c0_7 = arith.constant 0 : index
    %c0_8 = arith.constant 0 : index
    %4 = vector.load %arg6[%c0_7, %c0_8] : memref<9x256xf32, #tpu.memory_space<vmem>>, vector<9x256xf32>
    %c0_9 = arith.constant 0 : index
    %c0_10 = arith.constant 0 : index
    %c0_11 = arith.constant 0 : index
    %5 = vector.load %arg1[%c0_9, %c0_10, %c0_11] : memref<2x4x256xf32, #tpu.memory_space<vmem>>, vector<1x4x256xf32>
    %6 = vector.shape_cast %5 : vector<1x4x256xf32> to vector<4x256xf32>
    %7 = vector.shape_cast %1 : vector<4x1xf32> to vector<4x1xf32>
    %8 = vector.broadcast %7 : vector<4x1xf32> to vector<4x256xf32>
    %9 = vector.extract_strided_slice %0 {offsets = [0, 0], sizes = [4, 1], strides = [1, 1]} : vector<4x4xf32> to vector<4x1xf32>
    %10 = vector.extract_strided_slice %6 {offsets = [0, 0], sizes = [1, 256], strides = [1, 1]} : vector<4x256xf32> to vector<1x256xf32>
    %11 = vector.broadcast %9 : vector<4x1xf32> to vector<4x256xf32>
    %12 = vector.broadcast %10 : vector<1x256xf32> to vector<4x256xf32>
    %13 = arith.mulf %11, %12 : vector<4x256xf32>
    %14 = arith.addf %8, %13 : vector<4x256xf32>
    %15 = vector.extract_strided_slice %0 {offsets = [0, 1], sizes = [4, 1], strides = [1, 1]} : vector<4x4xf32> to vector<4x1xf32>
    %16 = vector.extract_strided_slice %6 {offsets = [1, 0], sizes = [1, 256], strides = [1, 1]} : vector<4x256xf32> to vector<1x256xf32>
    %17 = vector.broadcast %15 : vector<4x1xf32> to vector<4x256xf32>
    %18 = vector.broadcast %16 : vector<1x256xf32> to vector<4x256xf32>
    %19 = arith.mulf %17, %18 : vector<4x256xf32>
    %20 = arith.addf %14, %19 : vector<4x256xf32>
    %21 = vector.extract_strided_slice %0 {offsets = [0, 2], sizes = [4, 1], strides = [1, 1]} : vector<4x4xf32> to vector<4x1xf32>
    %22 = vector.extract_strided_slice %6 {offsets = [2, 0], sizes = [1, 256], strides = [1, 1]} : vector<4x256xf32> to vector<1x256xf32>
    %23 = vector.broadcast %21 : vector<4x1xf32> to vector<4x256xf32>
    %24 = vector.broadcast %22 : vector<1x256xf32> to vector<4x256xf32>
    %25 = arith.mulf %23, %24 : vector<4x256xf32>
    %26 = arith.addf %20, %25 : vector<4x256xf32>
    %27 = vector.extract_strided_slice %0 {offsets = [0, 3], sizes = [4, 1], strides = [1, 1]} : vector<4x4xf32> to vector<4x1xf32>
    %28 = vector.extract_strided_slice %6 {offsets = [3, 0], sizes = [1, 256], strides = [1, 1]} : vector<4x256xf32> to vector<1x256xf32>
    %29 = vector.broadcast %27 : vector<4x1xf32> to vector<4x256xf32>
    %30 = vector.broadcast %28 : vector<1x256xf32> to vector<4x256xf32>
    %31 = arith.mulf %29, %30 : vector<4x256xf32>
    %32 = arith.addf %26, %31 : vector<4x256xf32>
    %cst = arith.constant 0.000000e+00 : f32
    %33 = vector.broadcast %cst : f32 to vector<4x256xf32>
    %34 = arith.maximumf %32, %33 : vector<4x256xf32>
    %35 = vector.shape_cast %3 : vector<4x1xf32> to vector<4x1xf32>
    %36 = vector.broadcast %35 : vector<4x1xf32> to vector<4x256xf32>
    %c17_i32 = arith.constant 17 : i32
    %37 = tpu.dynamic_rotate %34 by %c17_i32 dim 1 : vector<4x256xf32>, i32 -> vector<4x256xf32>
    %38 = vector.extract_strided_slice %4 {offsets = [0, 0], sizes = [1, 256], strides = [1, 1]} : vector<9x256xf32> to vector<1x256xf32>
    %39 = vector.broadcast %38 : vector<1x256xf32> to vector<4x256xf32>
    %40 = arith.mulf %37, %39 : vector<4x256xf32>
    %41 = vector.extract_strided_slice %2 {offsets = [0, 0], sizes = [4, 1], strides = [1, 1]} : vector<4x9xf32> to vector<4x1xf32>
    %42 = vector.broadcast %41 : vector<4x1xf32> to vector<4x256xf32>
    %43 = arith.mulf %42, %40 : vector<4x256xf32>
    %44 = arith.addf %36, %43 : vector<4x256xf32>
    %c16_i32 = arith.constant 16 : i32
    %45 = tpu.dynamic_rotate %34 by %c16_i32 dim 1 : vector<4x256xf32>, i32 -> vector<4x256xf32>
    %46 = vector.extract_strided_slice %4 {offsets = [1, 0], sizes = [1, 256], strides = [1, 1]} : vector<9x256xf32> to vector<1x256xf32>
    %47 = vector.broadcast %46 : vector<1x256xf32> to vector<4x256xf32>
    %48 = arith.mulf %45, %47 : vector<4x256xf32>
    %49 = vector.extract_strided_slice %2 {offsets = [0, 1], sizes = [4, 1], strides = [1, 1]} : vector<4x9xf32> to vector<4x1xf32>
    %50 = vector.broadcast %49 : vector<4x1xf32> to vector<4x256xf32>
    %51 = arith.mulf %50, %48 : vector<4x256xf32>
    %52 = arith.addf %44, %51 : vector<4x256xf32>
    %c15_i32 = arith.constant 15 : i32
    %53 = tpu.dynamic_rotate %34 by %c15_i32 dim 1 : vector<4x256xf32>, i32 -> vector<4x256xf32>
    %54 = vector.extract_strided_slice %4 {offsets = [2, 0], sizes = [1, 256], strides = [1, 1]} : vector<9x256xf32> to vector<1x256xf32>
    %55 = vector.broadcast %54 : vector<1x256xf32> to vector<4x256xf32>
    %56 = arith.mulf %53, %55 : vector<4x256xf32>
    %57 = vector.extract_strided_slice %2 {offsets = [0, 2], sizes = [4, 1], strides = [1, 1]} : vector<4x9xf32> to vector<4x1xf32>
    %58 = vector.broadcast %57 : vector<4x1xf32> to vector<4x256xf32>
    %59 = arith.mulf %58, %56 : vector<4x256xf32>
    %60 = arith.addf %52, %59 : vector<4x256xf32>
    %c1_i32 = arith.constant 1 : i32
    %61 = tpu.dynamic_rotate %34 by %c1_i32 dim 1 : vector<4x256xf32>, i32 -> vector<4x256xf32>
    %62 = vector.extract_strided_slice %4 {offsets = [3, 0], sizes = [1, 256], strides = [1, 1]} : vector<9x256xf32> to vector<1x256xf32>
    %63 = vector.broadcast %62 : vector<1x256xf32> to vector<4x256xf32>
    %64 = arith.mulf %61, %63 : vector<4x256xf32>
    %65 = vector.extract_strided_slice %2 {offsets = [0, 3], sizes = [4, 1], strides = [1, 1]} : vector<4x9xf32> to vector<4x1xf32>
    %66 = vector.broadcast %65 : vector<4x1xf32> to vector<4x256xf32>
    %67 = arith.mulf %66, %64 : vector<4x256xf32>
    %68 = arith.addf %60, %67 : vector<4x256xf32>
    %69 = vector.extract_strided_slice %2 {offsets = [0, 4], sizes = [4, 1], strides = [1, 1]} : vector<4x9xf32> to vector<4x1xf32>
    %70 = vector.broadcast %69 : vector<4x1xf32> to vector<4x256xf32>
    %71 = arith.mulf %70, %34 : vector<4x256xf32>
    %72 = arith.addf %68, %71 : vector<4x256xf32>
    %c255_i32 = arith.constant 255 : i32
    %73 = tpu.dynamic_rotate %34 by %c255_i32 dim 1 : vector<4x256xf32>, i32 -> vector<4x256xf32>
    %74 = vector.extract_strided_slice %4 {offsets = [5, 0], sizes = [1, 256], strides = [1, 1]} : vector<9x256xf32> to vector<1x256xf32>
    %75 = vector.broadcast %74 : vector<1x256xf32> to vector<4x256xf32>
    %76 = arith.mulf %73, %75 : vector<4x256xf32>
    %77 = vector.extract_strided_slice %2 {offsets = [0, 5], sizes = [4, 1], strides = [1, 1]} : vector<4x9xf32> to vector<4x1xf32>
    %78 = vector.broadcast %77 : vector<4x1xf32> to vector<4x256xf32>
    %79 = arith.mulf %78, %76 : vector<4x256xf32>
    %80 = arith.addf %72, %79 : vector<4x256xf32>
    %c241_i32 = arith.constant 241 : i32
    %81 = tpu.dynamic_rotate %34 by %c241_i32 dim 1 : vector<4x256xf32>, i32 -> vector<4x256xf32>
    %82 = vector.extract_strided_slice %4 {offsets = [6, 0], sizes = [1, 256], strides = [1, 1]} : vector<9x256xf32> to vector<1x256xf32>
    %83 = vector.broadcast %82 : vector<1x256xf32> to vector<4x256xf32>
    %84 = arith.mulf %81, %83 : vector<4x256xf32>
    %85 = vector.extract_strided_slice %2 {offsets = [0, 6], sizes = [4, 1], strides = [1, 1]} : vector<4x9xf32> to vector<4x1xf32>
    %86 = vector.broadcast %85 : vector<4x1xf32> to vector<4x256xf32>
    %87 = arith.mulf %86, %84 : vector<4x256xf32>
    %88 = arith.addf %80, %87 : vector<4x256xf32>
    %c240_i32 = arith.constant 240 : i32
    %89 = tpu.dynamic_rotate %34 by %c240_i32 dim 1 : vector<4x256xf32>, i32 -> vector<4x256xf32>
    %90 = vector.extract_strided_slice %4 {offsets = [7, 0], sizes = [1, 256], strides = [1, 1]} : vector<9x256xf32> to vector<1x256xf32>
    %91 = vector.broadcast %90 : vector<1x256xf32> to vector<4x256xf32>
    %92 = arith.mulf %89, %91 : vector<4x256xf32>
    %93 = vector.extract_strided_slice %2 {offsets = [0, 7], sizes = [4, 1], strides = [1, 1]} : vector<4x9xf32> to vector<4x1xf32>
    %94 = vector.broadcast %93 : vector<4x1xf32> to vector<4x256xf32>
    %95 = arith.mulf %94, %92 : vector<4x256xf32>
    %96 = arith.addf %88, %95 : vector<4x256xf32>
    %c239_i32 = arith.constant 239 : i32
    %97 = tpu.dynamic_rotate %34 by %c239_i32 dim 1 : vector<4x256xf32>, i32 -> vector<4x256xf32>
    %98 = vector.extract_strided_slice %4 {offsets = [8, 0], sizes = [1, 256], strides = [1, 1]} : vector<9x256xf32> to vector<1x256xf32>
    %99 = vector.broadcast %98 : vector<1x256xf32> to vector<4x256xf32>
    %100 = arith.mulf %97, %99 : vector<4x256xf32>
    %101 = vector.extract_strided_slice %2 {offsets = [0, 8], sizes = [4, 1], strides = [1, 1]} : vector<4x9xf32> to vector<4x1xf32>
    %102 = vector.broadcast %101 : vector<4x1xf32> to vector<4x256xf32>
    %103 = arith.mulf %102, %100 : vector<4x256xf32>
    %104 = arith.addf %96, %103 : vector<4x256xf32>
    %cst_12 = arith.constant 0.000000e+00 : f32
    %105 = vector.broadcast %cst_12 : f32 to vector<4x256xf32>
    %106 = arith.maximumf %104, %105 : vector<4x256xf32>
    %107 = tpu.concatenate %34, %106 in 0 : vector<4x256xf32>, vector<4x256xf32> -> vector<8x256xf32>
    %c0_13 = arith.constant 0 : index
    %c0_14 = arith.constant 0 : index
    %c0_15 = arith.constant 0 : index
    %108 = vector.load %arg7[%c0_13, %c0_14, %c0_15] : memref<2x8x256xf32, #tpu.memory_space<vmem>>, vector<1x8x256xf32>
    %109 = vector.shape_cast %108 : vector<1x8x256xf32> to vector<8x256xf32>
    %110 = vector.shape_cast %107 : vector<8x256xf32> to vector<1x8x256xf32>
    tpu.vector_store %arg7[%c0_13, %c0_14, %c0_15], %110 {strides = array<i32>} : memref<2x8x256xf32, #tpu.memory_space<vmem>>, vector<1x8x256xf32>,
    %c1 = arith.constant 1 : index
    %c0_16 = arith.constant 0 : index
    %c0_17 = arith.constant 0 : index
    %111 = vector.load %arg1[%c1, %c0_16, %c0_17] : memref<2x4x256xf32, #tpu.memory_space<vmem>>, vector<1x4x256xf32>
    %112 = vector.shape_cast %111 : vector<1x4x256xf32> to vector<4x256xf32>
    %113 = vector.shape_cast %1 : vector<4x1xf32> to vector<4x1xf32>
    %114 = vector.broadcast %113 : vector<4x1xf32> to vector<4x256xf32>
    %115 = vector.extract_strided_slice %0 {offsets = [0, 0], sizes = [4, 1], strides = [1, 1]} : vector<4x4xf32> to vector<4x1xf32>
    %116 = vector.extract_strided_slice %112 {offsets = [0, 0], sizes = [1, 256], strides = [1, 1]} : vector<4x256xf32> to vector<1x256xf32>
    %117 = vector.broadcast %115 : vector<4x1xf32> to vector<4x256xf32>
    %118 = vector.broadcast %116 : vector<1x256xf32> to vector<4x256xf32>
    %119 = arith.mulf %117, %118 : vector<4x256xf32>
    %120 = arith.addf %114, %119 : vector<4x256xf32>
    %121 = vector.extract_strided_slice %0 {offsets = [0, 1], sizes = [4, 1], strides = [1, 1]} : vector<4x4xf32> to vector<4x1xf32>
    %122 = vector.extract_strided_slice %112 {offsets = [1, 0], sizes = [1, 256], strides = [1, 1]} : vector<4x256xf32> to vector<1x256xf32>
    %123 = vector.broadcast %121 : vector<4x1xf32> to vector<4x256xf32>
    %124 = vector.broadcast %122 : vector<1x256xf32> to vector<4x256xf32>
    %125 = arith.mulf %123, %124 : vector<4x256xf32>
    %126 = arith.addf %120, %125 : vector<4x256xf32>
    %127 = vector.extract_strided_slice %0 {offsets = [0, 2], sizes = [4, 1], strides = [1, 1]} : vector<4x4xf32> to vector<4x1xf32>
    %128 = vector.extract_strided_slice %112 {offsets = [2, 0], sizes = [1, 256], strides = [1, 1]} : vector<4x256xf32> to vector<1x256xf32>
    %129 = vector.broadcast %127 : vector<4x1xf32> to vector<4x256xf32>
    %130 = vector.broadcast %128 : vector<1x256xf32> to vector<4x256xf32>
    %131 = arith.mulf %129, %130 : vector<4x256xf32>
    %132 = arith.addf %126, %131 : vector<4x256xf32>
    %133 = vector.extract_strided_slice %0 {offsets = [0, 3], sizes = [4, 1], strides = [1, 1]} : vector<4x4xf32> to vector<4x1xf32>
    %134 = vector.extract_strided_slice %112 {offsets = [3, 0], sizes = [1, 256], strides = [1, 1]} : vector<4x256xf32> to vector<1x256xf32>
    %135 = vector.broadcast %133 : vector<4x1xf32> to vector<4x256xf32>
    %136 = vector.broadcast %134 : vector<1x256xf32> to vector<4x256xf32>
    %137 = arith.mulf %135, %136 : vector<4x256xf32>
    %138 = arith.addf %132, %137 : vector<4x256xf32>
    %cst_18 = arith.constant 0.000000e+00 : f32
    %139 = vector.broadcast %cst_18 : f32 to vector<4x256xf32>
    %140 = arith.maximumf %138, %139 : vector<4x256xf32>
    %141 = vector.shape_cast %3 : vector<4x1xf32> to vector<4x1xf32>
    %142 = vector.broadcast %141 : vector<4x1xf32> to vector<4x256xf32>
    %c17_i32_19 = arith.constant 17 : i32
    %143 = tpu.dynamic_rotate %140 by %c17_i32_19 dim 1 : vector<4x256xf32>, i32 -> vector<4x256xf32>
    %144 = vector.extract_strided_slice %4 {offsets = [0, 0], sizes = [1, 256], strides = [1, 1]} : vector<9x256xf32> to vector<1x256xf32>
    %145 = vector.broadcast %144 : vector<1x256xf32> to vector<4x256xf32>
    %146 = arith.mulf %143, %145 : vector<4x256xf32>
    %147 = vector.extract_strided_slice %2 {offsets = [0, 0], sizes = [4, 1], strides = [1, 1]} : vector<4x9xf32> to vector<4x1xf32>
    %148 = vector.broadcast %147 : vector<4x1xf32> to vector<4x256xf32>
    %149 = arith.mulf %148, %146 : vector<4x256xf32>
    %150 = arith.addf %142, %149 : vector<4x256xf32>
    %c16_i32_20 = arith.constant 16 : i32
    %151 = tpu.dynamic_rotate %140 by %c16_i32_20 dim 1 : vector<4x256xf32>, i32 -> vector<4x256xf32>
    %152 = vector.extract_strided_slice %4 {offsets = [1, 0], sizes = [1, 256], strides = [1, 1]} : vector<9x256xf32> to vector<1x256xf32>
    %153 = vector.broadcast %152 : vector<1x256xf32> to vector<4x256xf32>
    %154 = arith.mulf %151, %153 : vector<4x256xf32>
    %155 = vector.extract_strided_slice %2 {offsets = [0, 1], sizes = [4, 1], strides = [1, 1]} : vector<4x9xf32> to vector<4x1xf32>
    %156 = vector.broadcast %155 : vector<4x1xf32> to vector<4x256xf32>
    %157 = arith.mulf %156, %154 : vector<4x256xf32>
    %158 = arith.addf %150, %157 : vector<4x256xf32>
    %c15_i32_21 = arith.constant 15 : i32
    %159 = tpu.dynamic_rotate %140 by %c15_i32_21 dim 1 : vector<4x256xf32>, i32 -> vector<4x256xf32>
    %160 = vector.extract_strided_slice %4 {offsets = [2, 0], sizes = [1, 256], strides = [1, 1]} : vector<9x256xf32> to vector<1x256xf32>
    %161 = vector.broadcast %160 : vector<1x256xf32> to vector<4x256xf32>
    %162 = arith.mulf %159, %161 : vector<4x256xf32>
    %163 = vector.extract_strided_slice %2 {offsets = [0, 2], sizes = [4, 1], strides = [1, 1]} : vector<4x9xf32> to vector<4x1xf32>
    %164 = vector.broadcast %163 : vector<4x1xf32> to vector<4x256xf32>
    %165 = arith.mulf %164, %162 : vector<4x256xf32>
    %166 = arith.addf %158, %165 : vector<4x256xf32>
    %c1_i32_22 = arith.constant 1 : i32
    %167 = tpu.dynamic_rotate %140 by %c1_i32_22 dim 1 : vector<4x256xf32>, i32 -> vector<4x256xf32>
    %168 = vector.extract_strided_slice %4 {offsets = [3, 0], sizes = [1, 256], strides = [1, 1]} : vector<9x256xf32> to vector<1x256xf32>
    %169 = vector.broadcast %168 : vector<1x256xf32> to vector<4x256xf32>
    %170 = arith.mulf %167, %169 : vector<4x256xf32>
    %171 = vector.extract_strided_slice %2 {offsets = [0, 3], sizes = [4, 1], strides = [1, 1]} : vector<4x9xf32> to vector<4x1xf32>
    %172 = vector.broadcast %171 : vector<4x1xf32> to vector<4x256xf32>
    %173 = arith.mulf %172, %170 : vector<4x256xf32>
    %174 = arith.addf %166, %173 : vector<4x256xf32>
    %175 = vector.extract_strided_slice %2 {offsets = [0, 4], sizes = [4, 1], strides = [1, 1]} : vector<4x9xf32> to vector<4x1xf32>
    %176 = vector.broadcast %175 : vector<4x1xf32> to vector<4x256xf32>
    %177 = arith.mulf %176, %140 : vector<4x256xf32>
    %178 = arith.addf %174, %177 : vector<4x256xf32>
    %c255_i32_23 = arith.constant 255 : i32
    %179 = tpu.dynamic_rotate %140 by %c255_i32_23 dim 1 : vector<4x256xf32>, i32 -> vector<4x256xf32>
    %180 = vector.extract_strided_slice %4 {offsets = [5, 0], sizes = [1, 256], strides = [1, 1]} : vector<9x256xf32> to vector<1x256xf32>
    %181 = vector.broadcast %180 : vector<1x256xf32> to vector<4x256xf32>
    %182 = arith.mulf %179, %181 : vector<4x256xf32>
    %183 = vector.extract_strided_slice %2 {offsets = [0, 5], sizes = [4, 1], strides = [1, 1]} : vector<4x9xf32> to vector<4x1xf32>
    %184 = vector.broadcast %183 : vector<4x1xf32> to vector<4x256xf32>
    %185 = arith.mulf %184, %182 : vector<4x256xf32>
    %186 = arith.addf %178, %185 : vector<4x256xf32>
    %c241_i32_24 = arith.constant 241 : i32
    %187 = tpu.dynamic_rotate %140 by %c241_i32_24 dim 1 : vector<4x256xf32>, i32 -> vector<4x256xf32>
    %188 = vector.extract_strided_slice %4 {offsets = [6, 0], sizes = [1, 256], strides = [1, 1]} : vector<9x256xf32> to vector<1x256xf32>
    %189 = vector.broadcast %188 : vector<1x256xf32> to vector<4x256xf32>
    %190 = arith.mulf %187, %189 : vector<4x256xf32>
    %191 = vector.extract_strided_slice %2 {offsets = [0, 6], sizes = [4, 1], strides = [1, 1]} : vector<4x9xf32> to vector<4x1xf32>
    %192 = vector.broadcast %191 : vector<4x1xf32> to vector<4x256xf32>
    %193 = arith.mulf %192, %190 : vector<4x256xf32>
    %194 = arith.addf %186, %193 : vector<4x256xf32>
    %c240_i32_25 = arith.constant 240 : i32
    %195 = tpu.dynamic_rotate %140 by %c240_i32_25 dim 1 : vector<4x256xf32>, i32 -> vector<4x256xf32>
    %196 = vector.extract_strided_slice %4 {offsets = [7, 0], sizes = [1, 256], strides = [1, 1]} : vector<9x256xf32> to vector<1x256xf32>
    %197 = vector.broadcast %196 : vector<1x256xf32> to vector<4x256xf32>
    %198 = arith.mulf %195, %197 : vector<4x256xf32>
    %199 = vector.extract_strided_slice %2 {offsets = [0, 7], sizes = [4, 1], strides = [1, 1]} : vector<4x9xf32> to vector<4x1xf32>
    %200 = vector.broadcast %199 : vector<4x1xf32> to vector<4x256xf32>
    %201 = arith.mulf %200, %198 : vector<4x256xf32>
    %202 = arith.addf %194, %201 : vector<4x256xf32>
    %c239_i32_26 = arith.constant 239 : i32
    %203 = tpu.dynamic_rotate %140 by %c239_i32_26 dim 1 : vector<4x256xf32>, i32 -> vector<4x256xf32>
    %204 = vector.extract_strided_slice %4 {offsets = [8, 0], sizes = [1, 256], strides = [1, 1]} : vector<9x256xf32> to vector<1x256xf32>
    %205 = vector.broadcast %204 : vector<1x256xf32> to vector<4x256xf32>
    %206 = arith.mulf %203, %205 : vector<4x256xf32>
    %207 = vector.extract_strided_slice %2 {offsets = [0, 8], sizes = [4, 1], strides = [1, 1]} : vector<4x9xf32> to vector<4x1xf32>
    %208 = vector.broadcast %207 : vector<4x1xf32> to vector<4x256xf32>
    %209 = arith.mulf %208, %206 : vector<4x256xf32>
    %210 = arith.addf %202, %209 : vector<4x256xf32>
    %cst_27 = arith.constant 0.000000e+00 : f32
    %211 = vector.broadcast %cst_27 : f32 to vector<4x256xf32>
    %212 = arith.maximumf %210, %211 : vector<4x256xf32>
    %213 = tpu.concatenate %140, %212 in 0 : vector<4x256xf32>, vector<4x256xf32> -> vector<8x256xf32>
    %c1_28 = arith.constant 1 : index
    %c0_29 = arith.constant 0 : index
    %c0_30 = arith.constant 0 : index
    %214 = vector.load %arg7[%c1_28, %c0_29, %c0_30] : memref<2x8x256xf32, #tpu.memory_space<vmem>>, vector<1x8x256xf32>
    %215 = vector.shape_cast %214 : vector<1x8x256xf32> to vector<8x256xf32>
    %216 = vector.shape_cast %213 : vector<8x256xf32> to vector<1x8x256xf32>
    tpu.vector_store %arg7[%c1_28, %c0_29, %c0_30], %216 {strides = array<i32>} : memref<2x8x256xf32, #tpu.memory_space<vmem>>, vector<1x8x256xf32>,
    return
  }
  func.func @transform_0(%arg0: i32) -> (i32, i32, i32) {
    %c0_i32 = arith.constant 0 : i32
    %c0_i32_0 = arith.constant 0 : i32
    %c0_i32_1 = arith.constant 0 : i32
    return %arg0, %c0_i32, %c0_i32_0 : i32, i32, i32
  }
  func.func @transform_1(%arg0: i32) -> (i32, i32) {
    %c0_i32 = arith.constant 0 : i32
    %c0_i32_0 = arith.constant 0 : i32
    %c0_i32_1 = arith.constant 0 : i32
    return %c0_i32, %c0_i32_0 : i32, i32
  }
  func.func @transform_2(%arg0: i32) -> (i32, i32) {
    %c0_i32 = arith.constant 0 : i32
    %c0_i32_0 = arith.constant 0 : i32
    %c0_i32_1 = arith.constant 0 : i32
    return %c0_i32, %c0_i32_0 : i32, i32
  }
  func.func @transform_3(%arg0: i32) -> (i32, i32) {
    %c0_i32 = arith.constant 0 : i32
    %c0_i32_0 = arith.constant 0 : i32
    %c0_i32_1 = arith.constant 0 : i32
    return %c0_i32, %c0_i32_0 : i32, i32
  }
  func.func @transform_4(%arg0: i32) -> (i32, i32) {
    %c0_i32 = arith.constant 0 : i32
    %c0_i32_0 = arith.constant 0 : i32
    %c0_i32_1 = arith.constant 0 : i32
    return %c0_i32, %c0_i32_0 : i32, i32
  }
  func.func @transform_5(%arg0: i32) -> (i32, i32) {
    %c0_i32 = arith.constant 0 : i32
    %c0_i32_0 = arith.constant 0 : i32
    %c0_i32_1 = arith.constant 0 : i32
    return %c0_i32, %c0_i32_0 : i32, i32
  }
  func.func @transform_6(%arg0: i32) -> (i32, i32, i32) {
    %c0_i32 = arith.constant 0 : i32
    %c0_i32_0 = arith.constant 0 : i32
    %c0_i32_1 = arith.constant 0 : i32
    return %arg0, %c0_i32, %c0_i32_0 : i32, i32, i32
  }
}

</mosaic_0001>

<bundles_post_ra>
// kernel: tpu_custom_call.1
= control target key start
LH: loop header
LB: loop body
LE: loop exit
PB: predicated region body
PF: predicated region fallthrough
CT: control target
= control target key end

     0   :  { %11 = vsyncpa [#allocation3], 0  ;;  %s984_s0 = inlined_call_operand.hbm [shape: f32[2,4,256], index: 0, kind: input, shape index: {}]   ;;  %s985_s1 = inlined_call_operand.vmem [shape: f32[4,4], index: 1, kind: input, shape index: {}]   ;;  %s986_s2 = inlined_call_operand.vmem [shape: f32[4,1], index: 2, kind: input, shape index: {}]   ;;  %s987_s3 = inlined_call_operand.vmem [shape: f32[4,9], index: 3, kind: input, shape index: {}]   ;;  %s988_s4 = inlined_call_operand.vmem [shape: f32[4,1], index: 4, kind: input, shape index: {}]   ;;  %s989_s5 = inlined_call_operand.hbm [shape: f32[9,256], index: 5, kind: input, shape index: {}]   ;;  %s990_s6 = inlined_call_operand.hbm [shape: f32[2,8,256], index: 6, kind: output, shape index: {}]  }
   0x1   :  { %12 = vsyncpa [#allocation6], 0 }
   0x2   :  { %13 = vsyncpa [#allocation4], 0  ;;  %s18_s23 = sshll.u32 %s984_s0, 4  ;;  %s606_s24 = smov [#allocation2]   ;;  %s19_s23 = int_to_ptr.hbm [resolvable:$true] %s18_s23 }
   0x3   :  { %s20_s25 = sshll.u32 %s606_s24, 4  ;;  %s39_s28 = sshll.u32 %s989_s5, 4  ;;  %s21_s25 = int_to_ptr.vmem [resolvable:$true] %s20_s25  ;;  %s40_s28 = int_to_ptr.hbm [resolvable:$true] %s39_s28 }
   0x4   :  { %s607_s29 = smov 128   ;;  %s608_s30 = smov 8  }
   0x5   :  { %26 = dma.hbm_to_vmem [thread:$0]  %s19_s23, 256, %s21_s25, [#allocation3], %s607_s29, %s607_s29, %s608_s30  }
   0x6   :  { %s609_s7 = smov [#allocation5]   ;;  %s610_s9 = smov 256  }
   0x7   :  { %s41_s8 = sshll.u32 %s609_s7, 4  ;;  %s611_s10 = smov 16   ;;  %s42_s8 = int_to_ptr.vmem [resolvable:$true] %s41_s8 }
   0x8   :  { %47 = dma.hbm_to_vmem [thread:$0]  %s40_s28, 512, %s42_s8, [#allocation6], %s610_s9, %s610_s9, %s611_s10  }
   0x9   :  { %600 = dma.done.wait [#allocation3], 256  }
   0xa   :  { %601 = vsyncadd [#allocation3], 4294967040 }
   0xb   :  { %602 = dma.done.wait [#allocation6], 512  }
   0xc   :  { %603 = vsyncadd [#allocation6], 4294966784  ;;  %v612_v0 = vmov 0   ;;  %v613_v1 = vmov 1   ;;  %v614_v2 = vmov 3   ;;  %v615_v6 = vmov 2  }
   0xd   :  { %512 = vset.pattern.permute.xlu0 %v612_v0  ;;  %513 = vset.pattern.permute.xlu1 %v613_v1  ;;  %v57_v3 = vld [vmem:[%s986_s2] sm:$0xf]  ;;  %v616_v8 = vmov 4   ;;  %v617_v9 = vmov 5   ;;  %v618_v10 = vmov 6   ;;  %v312_v45 = vld [vmem:[#allocation2 + $0x8] sm:$0xff] }
   0xe   :  { %515 = vset.pattern.permute.xlu2 %v614_v2  ;;  %v56_v4 = vld [vmem:[%s985_s1] sm:$0xf]  ;;  %67 = vperm.xlu0 %512, %v57_v3   ;;  %v315_v46 = vperm.slane %v312_v45, 4  ;;  %v325_v54 = vperm.slane %v312_v45, 5  ;;  %s619_s1 = smov 127   ;;  %s620_s2 = smov 17  }
   0xf   :  { %87 = vperm.xlu1 %513, %v56_v4   ;;  %115 = vperm.xlu2 %515, %v56_v4   ;;  %v59_v5 = vld [vmem:[%s988_s4] sm:$0xf]  ;;  %v314_v55 = vperm.slane %v312_v45, 0  ;;  %v335_v57 = vperm.slane %v312_v45, 6  ;;  %v345_v62 = vperm.slane %v312_v45, 7  ;;  %v324_v63 = vperm.slane %v312_v45, 1 }
  0x10   :  { %v685_v7 = vld [vmem:[%s987_s3] sm:$0xf]  ;;  %v319_v51 = vperm.slane %v315_v46, 0  ;;  %v329_v58 = vperm.slane %v325_v54, 1  ;;  %s621_s3 = smov 113   ;;  %s622_s4 = smov 112  }
  0x11   :  { %v64_v11 = vld [vmem:[#allocation2] sm:$0xff]  ;;  %v318_v59 = vperm.slane %v314_v55, 0  ;;  %v339_v61 = vperm.slane %v335_v57, 2  ;;  %s623_s17 = smov 15   ;;  %s624_s18 = smov 1   ;;  %vm306_vm8 = vcmask 1043456  }
  0x12   :  { %v76_v14 = vperm.slane %v64_v11, 0  ;;  %v77_v15 = vperm.slane %v64_v11, 4  ;;  %v90_v16 = vperm.slane %v64_v11, 1  ;;  %v91_v17 = vperm.slane %v64_v11, 5  ;;  %s626_s19 = smov 111   ;;  %s628_s20 = smov [#allocation7]  }
  0x13   :  { %v104_v18 = vperm.slane %v64_v11, 2  ;;  %v105_v19 = vperm.slane %v64_v11, 6  ;;  %v118_v22 = vperm.slane %v64_v11, 3  ;;  %v119_v23 = vperm.slane %v64_v11, 7  ;;  %s473_s21 = sshll.u32 %s628_s20, 4  ;;  %s475_s24 = sshll.u32 %s990_s6, 4  ;;  %s474_s21 = int_to_ptr.vmem [resolvable:$true] %s473_s21  ;;  %s476_s24 = int_to_ptr.hbm [resolvable:$true] %s475_s24 }
  0x14   :  { %v80_v20 = vperm.slane %v76_v14, 0  ;;  %v81_v21 = vperm.slane %v77_v15, 0  ;;  %v94_v24 = vperm.slane %v90_v16, 1  ;;  %v95_v25 = vperm.slane %v91_v17, 1 }
  0x15   :  { %v108_v26 = vperm.slane %v104_v18, 2  ;;  %v109_v27 = vperm.slane %v105_v19, 2  ;;  %v122_v32 = vperm.slane %v118_v22, 3  ;;  %v123_v33 = vperm.slane %v119_v23, 3 }
  0x16   :  { %72 = vperm.xlu0 %512, %v56_v4   ;;  %v344_v11 = vperm.slane %v312_v45, 3  ;;  %v625_v23 = vmov 7  }
  0x17   :  { %514 = vset.pattern.permute.xlu1 %v615_v6  ;;  %516 = vset.pattern.permute.xlu2 %v612_v0 }
  0x18   :  { %101 = vperm.xlu1 %514, %v56_v4   ;;  %132 = vperm.xlu2 %516, %v59_v5   ;;  %v349_v5 = vperm.slane %v345_v62, 3  ;;  %v348_v18 = vperm.slane %v344_v11, 3 }
  0x1e   :  { %520 = vset.pattern.permute.xlu0 %v616_v8 }
  0x1f   :  { %215 = vperm.xlu0 %520, %v685_v7  }
  0x20   :  { %150 = vperm.xlu2 %516, %v685_v7   ;;  %521 = vset.pattern.permute.xlu1 %v617_v9 }
  0x21   :  { %234 = vperm.xlu1 %521, %v685_v7  }
  0x28   :  { %517 = vset.pattern.permute.xlu2 %v613_v1  ;;  %v334_v1 = vperm.slane %v312_v45, 2 }
  0x29   :  { %169 = vperm.xlu2 %517, %v685_v7   ;;  %522 = vset.pattern.permute.xlu1 %v618_v10 }
  0x2a   :  { %253 = vperm.xlu1 %522, %v685_v7   ;;  %v338_v8 = vperm.slane %v334_v1, 2 }
  0x31   :  { %518 = vset.pattern.permute.xlu2 %v615_v6  ;;  %v328_v6 = vperm.slane %v324_v63, 1 }
  0x32   :  { %188 = vperm.xlu2 %518, %v685_v7   ;;  %523 = vset.pattern.permute.xlu1 %v625_v23 }
  0x3a   :  { %519 = vset.pattern.permute.xlu2 %v614_v2 }
  0x3b   :  { %207 = vperm.xlu2 %519, %v685_v7  }
  0x69   :  { %v116_v36 = vpop.permute.xlu2 %115 }
  0x6a   :  { %v124_v43 = vmul.f32 %v122_v32, %v116_v36  ;;  %v125_v44 = vmul.f32 %v123_v33, %v116_v36  ;;  %v351_v14 = vmul.f32 %v349_v5, %v116_v36  ;;  %v139_v32 = vlaneseq }
  0x80   :  { %v694_v12 = vpop.permute.xlu0 %67 }
  0x81   :  { %v696_v13 = vpop.permute.xlu1 %87 }
  0x82   :  { %v96_v34 = vmul.f32 %v94_v24, %v696_v13  ;;  %v97_v35 = vmul.f32 %v95_v25, %v696_v13  ;;  %v331_v0 = vmul.f32 %v329_v58, %v696_v13  ;;  %v330_v15 = vmul.f32 %v328_v6, %v696_v13  ;;  %v754_v24 = vpop.permute.xlu2 %132 }
  0x83   :  { %v627_v25 = vmov 8  }
  0x84   :  { %524 = vset.pattern.permute.xlu2 %v627_v25  ;;  %525 = vset.pattern.permute.xlu0 %v627_v25 }
  0x88   :  { %v73_v28 = vpop.permute.xlu0 %72 }
  0x89   :  { %v82_v29 = vmul.f32 %v80_v20, %v73_v28  ;;  %v83_v30 = vmul.f32 %v81_v21, %v73_v28  ;;  %v321_v56 = vmul.f32 %v319_v51, %v73_v28  ;;  %v320_v2 = vmul.f32 %v318_v59, %v73_v28 }
  0x8a   :  { %v102_v31 = vpop.permute.xlu1 %101 }
  0x8b   :  { %v84_v37 = vadd.f32 %v82_v29, %v694_v12  ;;  %v85_v38 = vadd.f32 %v83_v30, %v694_v12  ;;  %v110_v39 = vmul.f32 %v108_v26, %v102_v31  ;;  %v111_v40 = vmul.f32 %v109_v27, %v102_v31  ;;  %v766_v26 = vpop.permute.xlu2 %150 }
  0x8c   :  { %v323_v60 = vadd.f32 %v321_v56, %v694_v12  ;;  %v341_v4 = vmul.f32 %v339_v61, %v102_v31  ;;  %v322_v9 = vadd.f32 %v320_v2, %v694_v12  ;;  %v340_v17 = vmul.f32 %v338_v8, %v102_v31 }
  0x8d   :  { %v98_v41 = vadd.f32 %v96_v34, %v84_v37  ;;  %v99_v42 = vadd.f32 %v97_v35, %v85_v38  ;;  %v350_v12 = vmul.f32 %v348_v18, %v116_v36  ;;  %v784_v34 = vand.u32 127, %v139_v32  ;;  %v786_v35 = vld [vmem:[#allocation5] sm:$0xff]  ;;  %v788_v36 = vld [vmem:[#allocation5 + $0x8] sm:$0xff] }
  0x8e   :  { %v333_v3 = vadd.f32 %v331_v0, %v323_v60  ;;  %v332_v16 = vadd.f32 %v330_v15, %v322_v9  ;;  %v144_v38 = vperm.slane %v786_v35, 0  ;;  %v164_v45 = vperm.slane %v786_v35, 1 }
  0x8f   :  { %v112_v47 = vadd.f32 %v110_v39, %v98_v41  ;;  %v113_v48 = vadd.f32 %v111_v40, %v99_v42  ;;  %vm141_vm0 = vcmp.lt.s32.totalorder %v784_v34, 17  ;;  %v145_v39 = vperm.slane %v788_v36, 0 }
  0x90   :  { %v343_v10 = vadd.f32 %v341_v4, %v333_v3  ;;  %v342_v20 = vadd.f32 %v340_v17, %v332_v16  ;;  %vm161_vm1 = vcmp.lt.s32.totalorder %v784_v34, 16  ;;  %v165_v46 = vperm.slane %v788_v36, 1 }
  0x91   :  { %v126_v49 = vadd.f32 %v124_v43, %v112_v47  ;;  %v127_v50 = vadd.f32 %v125_v44, %v113_v48  ;;  %v782_v33 = vpop.permute.xlu0 %215  ;;  %vm180_vm2 = vcmp.lt.s32.totalorder %v784_v34, 15  ;;  %v184_v2 = vperm.slane %v788_v36, 2 }
  0x92   :  { %v353_v19 = vadd.f32 %v351_v14, %v343_v10  ;;  %v352_v13 = vadd.f32 %v350_v12, %v342_v20  ;;  %vm199_vm3 = vcmp.lt.s32.totalorder %v784_v34, 1  ;;  %v203_v6 = vperm.slane %v788_v36, 3 }
  0x93   :  { %v702_v52 = vmax.f32 %v126_v49, 0.0  ;;  %v704_v53 = vmax.f32 %v127_v50, 0.0  ;;  %v770_v27 = vpop.permute.xlu2 %169  ;;  %v776_v29 = vpop.permute.xlu1 %234  ;;  %vm226_vm4 = vcmp.lt.s32.totalorder %v784_v34, 127  ;;  %v230_v18 = vperm.slane %v788_v36, 5 }
  0x94   :  { %v726_v21 = vmax.f32 %v353_v19, 0.0  ;;  %v732_v22 = vmax.f32 %v352_v13, 0.0  ;;  %vm245_vm5 = vcmp.lt.s32.totalorder %v784_v34, 113  ;;  %vm264_vm6 = vcmp.lt.s32.totalorder %v784_v34, 112 }
  0x95   :  { %224 = vrot.lane.b32.xlu2 %v704_v53, %s619_s1  ;;  %137 = vrot.lane.b32.xlu1 %v704_v53, %s620_s2  ;;  %v219_v23 = vmul.f32 %v782_v33, %v704_v53  ;;  %vm283_vm7 = vcmp.lt.s32.totalorder %v784_v34, 111 }
  0x96   :  { %135 = vrot.lane.b32.xlu0 %v702_v52, %s620_s2 }
  0x9b   :  { %v774_v28 = vpop.permute.xlu2 %188 }
  0x9c   :  { %v780_v31 = vpop.permute.xlu1 %253 }
  0x9d   :  { %241 = vrot.lane.b32.xlu2 %v702_v52, %s621_s3  ;;  %159 = vrot.lane.b32.xlu1 %v704_v53, %s611_s10 }
  0x9e   :  { %157 = vrot.lane.b32.xlu0 %v702_v52, %s611_s10 }
  0xa3   :  { %v778_v30 = vpop.permute.xlu2 %207 }
  0xa5   :  { %260 = vrot.lane.b32.xlu2 %v702_v52, %s622_s4  ;;  %178 = vrot.lane.b32.xlu1 %v704_v53, %s623_s17 }
  0xa6   :  { %176 = vrot.lane.b32.xlu0 %v702_v52, %s623_s17 }
  0xad   :  { %358 = vrot.lane.b32.xlu2 %v726_v21, %s620_s2  ;;  %197 = vrot.lane.b32.xlu1 %v704_v53, %s624_s18 }
  0xae   :  { %195 = vrot.lane.b32.xlu0 %v702_v52, %s624_s18 }
  0xb5   :  { %380 = vrot.lane.b32.xlu2 %v732_v22, %s623_s17  ;;  %222 = vrot.lane.b32.xlu1 %v702_v52, %s619_s1 }
  0xb6   :  { %243 = vrot.lane.b32.xlu0 %v704_v53, %s621_s3 }
  0xbd   :  { %394 = vrot.lane.b32.xlu2 %v726_v21, %s624_s18  ;;  %356 = vrot.lane.b32.xlu1 %v732_v22, %s620_s2 }
  0xbe   :  { %262 = vrot.lane.b32.xlu0 %v704_v53, %s622_s4 }
  0xc5   :  { %420 = vrot.lane.b32.xlu2 %v732_v22, %s621_s3  ;;  %370 = vrot.lane.b32.xlu1 %v726_v21, %s611_s10 }
  0xc6   :  { %368 = vrot.lane.b32.xlu0 %v732_v22, %s611_s10 }
  0xcd   :  { %434 = vrot.lane.b32.xlu2 %v726_v21, %s622_s4  ;;  %392 = vrot.lane.b32.xlu1 %v732_v22, %s624_s18 }
  0xce   :  { %382 = vrot.lane.b32.xlu0 %v726_v21, %s623_s17 }
  0xd5   :  { %444 = vrot.lane.b32.xlu2 %v732_v22, %s626_s19  ;;  %410 = vrot.lane.b32.xlu1 %v726_v21, %s619_s1 }
  0xd6   :  { %408 = vrot.lane.b32.xlu0 %v732_v22, %s619_s1 }
  0xdd   :  { %291 = vperm.xlu2 %524, %v685_v7   ;;  %432 = vrot.lane.b32.xlu1 %v732_v22, %s622_s4 }
  0xde   :  { %422 = vrot.lane.b32.xlu0 %v726_v21, %s621_s3 }
  0xe5   :  { %281 = vrot.lane.b32.xlu1 %v704_v53, %s626_s19 }
  0xe6   :  { %279 = vrot.lane.b32.xlu0 %v702_v52, %s626_s19 }
  0xed   :  { %272 = vperm.xlu1 %523, %v685_v7  }
  0xee   :  { %446 = vrot.lane.b32.xlu0 %v726_v21, %s626_s19 }
  0xef   :  { %v791_v7 = vpop.permute.xlu2 %224 }
  0xf7   :  { %v808_v51 = vpop.permute.xlu2 %241 }
  0xff   :  { %v826_v3 = vpop.permute.xlu2 %260 }
 0x107   :  { %v138_v37 = vpop.permute.xlu1 %137  ;;  %v359_v16 = vpop.permute.xlu2 %358 }
 0x108   :  { %v136_v40 = vpop.permute.xlu0 %135 }
 0x109   :  { %v142_v41 = vsel %vm141_vm0, %v136_v40, %v138_v37  ;;  %v143_v42 = vsel %vm141_vm0, %v138_v37, %v136_v40 }
 0x10a   :  { %v146_v43 = vmul.f32 %v144_v38, %v143_v42  ;;  %v147_v44 = vmul.f32 %v145_v39, %v142_v41 }
 0x10c   :  { %v153_v47 = vmul.f32 %v766_v26, %v146_v43  ;;  %v154_v48 = vmul.f32 %v766_v26, %v147_v44 }
 0x10e   :  { %v155_v58 = vadd.f32 %v153_v47, %v754_v24  ;;  %v156_v59 = vadd.f32 %v154_v48, %v754_v24 }
 0x10f   :  { %v160_v49 = vpop.permute.xlu1 %159  ;;  %v381_v41 = vpop.permute.xlu2 %380 }
 0x110   :  { %v158_v50 = vpop.permute.xlu0 %157 }
 0x111   :  { %v162_v54 = vsel %vm161_vm1, %v158_v50, %v160_v49  ;;  %v163_v55 = vsel %vm161_vm1, %v160_v49, %v158_v50 }
 0x112   :  { %v166_v56 = vmul.f32 %v164_v45, %v163_v55  ;;  %v167_v57 = vmul.f32 %v165_v46, %v162_v54  ;;  %v183_v55 = vperm.slane %v786_v35, 2 }
 0x114   :  { %v172_v60 = vmul.f32 %v770_v27, %v166_v56  ;;  %v173_v61 = vmul.f32 %v770_v27, %v167_v57  ;;  %v202_v57 = vperm.slane %v786_v35, 3 }
 0x116   :  { %v822_v62 = vadd.f32 %v172_v60, %v155_v58  ;;  %v175_v63 = vadd.f32 %v173_v61, %v156_v59 }
 0x117   :  { %v179_v0 = vpop.permute.xlu1 %178  ;;  %v395_v48 = vpop.permute.xlu2 %394 }
 0x118   :  { %v177_v1 = vpop.permute.xlu0 %176 }
 0x119   :  { %v181_v4 = vsel %vm180_vm2, %v177_v1, %v179_v0  ;;  %v182_v56 = vsel %vm180_vm2, %v179_v0, %v177_v1 }
 0x11a   :  { %v186_v5 = vmul.f32 %v184_v2, %v181_v4  ;;  %v185_v61 = vmul.f32 %v183_v55, %v182_v56 }
 0x11c   :  { %v192_v11 = vmul.f32 %v774_v28, %v186_v5 }
 0x11e   :  { %v194_v17 = vadd.f32 %v192_v11, %v175_v63 }
 0x11f   :  { %v198_v8 = vpop.permute.xlu1 %197  ;;  %v854_v54 = vpop.permute.xlu2 %420 }
 0x120   :  { %v196_v9 = vpop.permute.xlu0 %195 }
 0x121   :  { %v200_v10 = vsel %vm199_vm3, %v196_v9, %v198_v8  ;;  %v201_v60 = vsel %vm199_vm3, %v198_v8, %v196_v9 }
 0x122   :  { %v205_v14 = vmul.f32 %v203_v6, %v200_v10  ;;  %v204_v11 = vmul.f32 %v202_v57, %v201_v60 }
 0x124   :  { %v211_v15 = vmul.f32 %v778_v30, %v205_v14 }
 0x126   :  { %v213_v19 = vadd.f32 %v211_v15, %v194_v17 }
 0x127   :  { %v223_v20 = vpop.permute.xlu1 %222  ;;  %v883_v17 = vpop.permute.xlu2 %434 }
 0x128   :  { %v840_v12 = vpop.permute.xlu0 %243  ;;  %v228_v13 = vsel %vm226_vm4, %v791_v7, %v223_v20  ;;  %v221_v32 = vadd.f32 %v219_v23, %v213_v19  ;;  %v229_v19 = vperm.slane %v786_v35, 5  ;;  %v227_v23 = vsel %vm226_vm4, %v223_v20, %v791_v7 }
 0x129   :  { %v232_v25 = vmul.f32 %v230_v18, %v228_v13 }
 0x12b   :  { %v238_v37 = vmul.f32 %v776_v29, %v232_v25 }
 0x12d   :  { %v850_v40 = vadd.f32 %v238_v37, %v221_v32  ;;  %v218_v37 = vmul.f32 %v782_v33, %v702_v52 }
 0x12f   :  { %v357_v42 = vpop.permute.xlu1 %356 }
 0x130   :  { %v852_v43 = vpop.permute.xlu0 %262  ;;  %v360_v58 = vsel %vm141_vm0, %v357_v42, %v359_v16  ;;  %v361_v59 = vsel %vm141_vm0, %v359_v16, %v357_v42  ;;  %v191_v16 = vmul.f32 %v774_v28, %v185_v61 }
 0x131   :  { %v362_v1 = vmul.f32 %v361_v59, %v144_v38  ;;  %v363_v10 = vmul.f32 %v360_v58, %v145_v39  ;;  %v249_v58 = vperm.slane %v788_v36, 6 }
 0x133   :  { %v364_v38 = vmul.f32 %v362_v1, %v766_v26  ;;  %v365_v39 = vmul.f32 %v363_v10, %v766_v26  ;;  %v404_v26 = vmul.f32 %v732_v22, %v782_v33 }
 0x135   :  { %v367_v7 = vadd.f32 %v365_v39, %v754_v24 }
 0x137   :  { %v371_v44 = vpop.permute.xlu1 %370 }
 0x138   :  { %v369_v47 = vpop.permute.xlu0 %368 }
 0x139   :  { %v372_v63 = vsel %vm161_vm1, %v369_v47, %v371_v44  ;;  %v373_v4 = vsel %vm161_vm1, %v371_v44, %v369_v47  ;;  %v366_v44 = vadd.f32 %v364_v38, %v754_v24  ;;  %v231_v47 = vmul.f32 %v229_v19, %v227_v23 }
 0x13a   :  { %v374_v14 = vmul.f32 %v373_v4, %v164_v45  ;;  %v375_v8 = vmul.f32 %v372_v63, %v165_v46  ;;  %v210_v46 = vmul.f32 %v778_v30, %v204_v11 }
 0x13b   :  { %v237_v4 = vmul.f32 %v776_v29, %v231_v47 }
 0x13c   :  { %v376_v25 = vmul.f32 %v374_v14, %v770_v27  ;;  %v377_v32 = vmul.f32 %v375_v8, %v770_v27 }
 0x13e   :  { %v378_v59 = vadd.f32 %v376_v25, %v366_v44  ;;  %v379_v60 = vadd.f32 %v377_v32, %v367_v7  ;;  %v526_v25 = vld [vmem:[#allocation5 + $0x10] ss:$0 sm:$0xff]  ;;  %v527_v32 = vld [vmem:[#allocation5 + $0x18] ss:$0 sm:$0xff] }
 0x13f   :  { %v393_v49 = vpop.permute.xlu1 %392 }
 0x140   :  { %v383_v50 = vpop.permute.xlu0 %382  ;;  %v396_v20 = vsel %vm199_vm3, %v393_v49, %v395_v48  ;;  %v397_v27 = vsel %vm199_vm3, %v395_v48, %v393_v49  ;;  %v267_v49 = vperm.slane %v786_v35, 7 }
 0x141   :  { %v384_v9 = vsel %vm180_vm2, %v381_v41, %v383_v50  ;;  %v385_v15 = vsel %vm180_vm2, %v383_v50, %v381_v41  ;;  %v193_v41 = vadd.f32 %v191_v16, %v822_v62  ;;  %v248_v50 = vperm.slane %v786_v35, 6 }
 0x142   :  { %v386_v45 = vmul.f32 %v385_v15, %v183_v55  ;;  %v387_v13 = vmul.f32 %v384_v9, %v184_v2  ;;  %v398_v61 = vmul.f32 %v397_v27, %v202_v57  ;;  %v399_v24 = vmul.f32 %v396_v20, %v203_v6 }
 0x143   :  { %v212_v56 = vadd.f32 %v210_v46, %v193_v41  ;;  %v268_v57 = vperm.slane %v788_v36, 7  ;;  %v247_v6 = vsel %vm245_vm5, %v840_v12, %v808_v51  ;;  %v265_v36 = vsel %vm264_vm6, %v826_v3, %v852_v43 }
 0x144   :  { %v388_v55 = vmul.f32 %v386_v45, %v774_v28  ;;  %v389_v62 = vmul.f32 %v387_v13, %v774_v28  ;;  %v246_v28 = vsel %vm245_vm5, %v808_v51, %v840_v12  ;;  %v400_v15 = vmul.f32 %v398_v61, %v778_v30 }
 0x145   :  { %v220_v8 = vadd.f32 %v218_v37, %v212_v56  ;;  %v250_v9 = vmul.f32 %v248_v50, %v246_v28  ;;  %v401_v51 = vmul.f32 %v399_v24, %v778_v30  ;;  %v251_v38 = vmul.f32 %v249_v58, %v247_v6 }
 0x146   :  { %v390_v1 = vadd.f32 %v388_v55, %v378_v59  ;;  %v405_v30 = vmul.f32 %v726_v21, %v782_v33 }
 0x147   :  { %v411_v5 = vpop.permute.xlu1 %410  ;;  %v239_v13 = vadd.f32 %v237_v4, %v220_v8  ;;  %v256_v41 = vmul.f32 %v780_v31, %v250_v9 }
 0x148   :  { %v409_v0 = vpop.permute.xlu0 %408 }
 0x149   :  { %v412_v63 = vsel %vm226_vm4, %v409_v0, %v411_v5  ;;  %v413_v48 = vsel %vm226_vm4, %v411_v5, %v409_v0  ;;  %v391_v5 = vadd.f32 %v389_v62, %v379_v60  ;;  %v445_v0 = vpop.permute.xlu2 %444  ;;  %v258_v56 = vadd.f32 %v256_v41, %v239_v13 }
 0x14a   :  { %v414_v10 = vmul.f32 %v412_v63, %v229_v19  ;;  %v415_v11 = vmul.f32 %v413_v48, %v230_v18  ;;  %v266_v18 = vsel %vm264_vm6, %v852_v43, %v826_v3 }
 0x14b   :  { %v403_v39 = vadd.f32 %v401_v51, %v391_v5  ;;  %v270_v44 = vmul.f32 %v268_v57, %v266_v18 }
 0x14c   :  { %v416_v46 = vmul.f32 %v414_v10, %v776_v29  ;;  %v417_v23 = vmul.f32 %v415_v11, %v776_v29  ;;  %v257_v29 = vmul.f32 %v780_v31, %v251_v38 }
 0x14d   :  { %v407_v20 = vadd.f32 %v405_v30, %v403_v39 }
 0x14f   :  { %v433_v2 = vpop.permute.xlu1 %432  ;;  %v419_v60 = vadd.f32 %v417_v23, %v407_v20 }
 0x150   :  { %v423_v42 = vpop.permute.xlu0 %422  ;;  %v436_v3 = vsel %vm264_vm6, %v433_v2, %v883_v17  ;;  %v437_v43 = vsel %vm264_vm6, %v883_v17, %v433_v2 }
 0x151   :  { %v424_v35 = vsel %vm245_vm5, %v854_v54, %v423_v42  ;;  %v425_v14 = vsel %vm245_vm5, %v423_v42, %v854_v54  ;;  %v402_v54 = vadd.f32 %v400_v15, %v390_v1  ;;  %v269_v42 = vmul.f32 %v267_v49, %v265_v36  ;;  %v292_v62 = vpop.permute.xlu2 %291 }
 0x152   :  { %v426_v19 = vmul.f32 %v424_v35, %v248_v50  ;;  %v427_v45 = vmul.f32 %v425_v14, %v249_v58  ;;  %v438_v50 = vmul.f32 %v436_v3, %v267_v49  ;;  %v439_v17 = vmul.f32 %v437_v43, %v268_v57 }
 0x153   :  { %v406_v7 = vadd.f32 %v404_v26, %v402_v54  ;;  %v259_v58 = vadd.f32 %v257_v29, %v850_v40 }
 0x154   :  { %v428_v27 = vmul.f32 %v426_v19, %v780_v31  ;;  %v429_v47 = vmul.f32 %v427_v45, %v780_v31 }
 0x155   :  { %v418_v59 = vadd.f32 %v416_v46, %v406_v7 }
 0x156   :  { %v431_v6 = vadd.f32 %v429_v47, %v419_v60 }
 0x157   :  { %v282_v12 = vpop.permute.xlu1 %281  ;;  %v430_v4 = vadd.f32 %v428_v27, %v418_v59 }
 0x158   :  { %v280_v16 = vpop.permute.xlu0 %279 }
 0x159   :  { %v284_v37 = vsel %vm283_vm7, %v280_v16, %v282_v12  ;;  %v285_v33 = vsel %vm283_vm7, %v282_v12, %v280_v16 }
 0x15a   :  { %v288_v2 = vmul.f32 %v526_v25, %v284_v37  ;;  %v289_v55 = vmul.f32 %v527_v32, %v285_v33 }
 0x15c   :  { %v294_v57 = vmul.f32 %v292_v62, %v288_v2  ;;  %v295_v1 = vmul.f32 %v292_v62, %v289_v55 }
 0x15f   :  { %v273_v61 = vpop.permute.xlu1 %272 }
 0x160   :  { %v447_v24 = vpop.permute.xlu0 %446  ;;  %v275_v63 = vmul.f32 %v273_v61, %v269_v42  ;;  %v276_v48 = vmul.f32 %v273_v61, %v270_v44  ;;  %v440_v26 = vmul.f32 %v438_v50, %v273_v61  ;;  %v441_v28 = vmul.f32 %v439_v17, %v273_v61 }
 0x161   :  { %v448_v31 = vsel %vm283_vm7, %v445_v0, %v447_v24  ;;  %v449_v49 = vsel %vm283_vm7, %v447_v24, %v445_v0 }
 0x162   :  { %v277_v5 = vadd.f32 %v275_v63, %v258_v56  ;;  %v278_v40 = vadd.f32 %v276_v48, %v259_v58  ;;  %v442_v10 = vadd.f32 %v440_v26, %v430_v4  ;;  %v443_v11 = vadd.f32 %v441_v28, %v431_v6 }
 0x163   :  { %v450_v35 = vmul.f32 %v526_v25, %v448_v31  ;;  %v451_v14 = vmul.f32 %v527_v32, %v449_v49 }
 0x164   :  { %v296_v8 = vadd.f32 %v294_v57, %v277_v5  ;;  %v297_v9 = vadd.f32 %v295_v1, %v278_v40 }
 0x165   :  { %v452_v15 = vmul.f32 %v450_v35, %v292_v62  ;;  %v453_v51 = vmul.f32 %v451_v14, %v292_v62 }
 0x166   :  { %v298_v12 = vmax.f32 %v296_v8, 0.0  ;;  %v299_v16 = vmax.f32 %v297_v9, 0.0 }
 0x167   :  { %v454_v38 = vadd.f32 %v452_v15, %v442_v10  ;;  %v455_v36 = vadd.f32 %v453_v51, %v443_v11 }
 0x168   :  { %v302_v18 = vrot.slane %v298_v12, 4  ;;  %v303_v34 = vrot.slane %v299_v16, 4 }
 0x169   :  { %v456_v0 = vmax.f32 %v454_v38, 0.0  ;;  %v457_v54 = vmax.f32 %v455_v36, 0.0 }
 0x16a   :  { %v307_v39 = vsel %vm306_vm8, %v702_v52, %v302_v18  ;;  %v308_v19 = vsel %vm306_vm8, %v704_v53, %v303_v34 }
 0x16b   :  { %v460_v45 = vrot.slane %v456_v0, 4  ;;  %v461_v30 = vrot.slane %v457_v54, 4  ;;  %309 = vst [vmem:[#allocation7] sm:$0xff] %v307_v39 }
 0x16c   :  { %310 = vst [vmem:[#allocation7 + $0x8] sm:$0xff] %v308_v19 }
 0x16d   :  { %v464_v13 = vsel %vm306_vm8, %v732_v22, %v460_v45  ;;  %v465_v46 = vsel %vm306_vm8, %v726_v21, %v461_v30 }
 0x16e   :  { %467 = vst [vmem:[#allocation7 + $0x10] sm:$0xff] %v464_v13 }
 0x16f   :  { %468 = vst [vmem:[#allocation7 + $0x18] sm:$0xff] %v465_v46 }
 0x170   :  { %481 = dma.vmem_to_hbm [thread:$0]  %s474_s21, 512, %s476_s24, [#allocation4], %s610_s9, %s610_s9, %s611_s10  }
 0x171   :  { %604 = dma.done.wait [#allocation4], 512  }
 0x172   :  { %605 = vsyncadd [#allocation4], 4294966784 }
 0x173   :  { %486 = vsyncpa [#allocation3], 1 }
 0x174   :  { %487 = vsyncpa [#allocation6], 1 }
 0x175   :  { %488 = vsyncpa [#allocation4], 1 }

</bundles_post_ra>
